<compile_context>
chip_gen: v7x
topology: tpu7x:2x2x1
jax: 0.10.0
libtpu: 0.0.40
codegen_flags: <defaults>
</compile_context>

<pallas_src>
import math
from functools import partial

import jax
import jax.numpy as jnp
from jax.experimental import pallas as pl
from jax.experimental.pallas import tpu as pltpu


# ----------------------------- Pallas kernel --------------------------------
def resblockd0_kernel(xwin_ref, rowpos_ref, w1_ref, w2_ref, b1_ref, bo_ref,
                      o_ref, *, half_len, hidden):
    # xwin_ref  : (TM, 6*C)   bf16 local input window [x[2m-2] ... x[2m+3]]
    # rowpos_ref: (TM, 1)     int32 pooled-row index within its batch element
    # w1_ref    : (6*C, 5*H)  bf16 conv1 taps (4 act groups) + bypass columns
    # w2_ref    : (4*H, H)    bf16 conv2 taps with AvgPool1d(2) folded in
    # b1_ref    : (1, 4*H)    f32 conv1 bias tiled over the 4 act positions
    # bo_ref    : (1, H)      f32 combined output bias (b2 + bb)
    # o_ref     : (TM, H)     f32 output tile
    h4 = 4 * hidden

    # Fused conv1 (4 act positions per pooled row) + bypass, one dense dot.
    fused = jnp.dot(xwin_ref[...], w1_ref[...],
                    preferred_element_type=jnp.float32)
    pre = fused[:, :h4] + b1_ref[...]          # conv1 pre-activations (f32)
    byp = fused[:, h4:]                        # avgpool(x) @ bypass_conv

    # conv2's "same" padding zero-pads the *activation*: act[-1] and act[L]
    # must contribute zero.  Zero those column groups on the first / last
    # pooled row of each batch element (cheap VPU mask, no scratch).
    row = rowpos_ref[...]                                              # (TM,1)
    col = jax.lax.broadcasted_iota(jnp.int32, (1, h4), 1)              # (1,4H)
    pad_pos = ((row == 0) & (col < hidden)) | \
              ((row == half_len - 1) & (col >= 3 * hidden))
    pre = jnp.where(pad_pos, 0.0, pre)

    # LeakyReLU(0.1) in f32, then bf16 for the MXU.
    act = jnp.maximum(pre, 0.1 * pre).astype(w2_ref.dtype)

    # conv2 + AvgPool1d(2) as one dense contraction, plus bypass and bias.
    o_ref[...] = (jnp.dot(act, w2_ref[...], preferred_element_type=jnp.float32)
                  + byp + bo_ref[...])


# -------------------------- weight repacking (wrapper) -----------------------
def _pack_weights(params, compute_dtype=jnp.bfloat16):
    w1, w2, wb = params['w1'], params['w2'], params['wb']
    b1, b2, bb = params['b1'], params['b2'], params['bb']
    H, C, _ = w1.shape

    T = [w1[:, :, k].T for k in range(3)]        # conv1 taps, each (C, H)
    V = [w2[:, :, k].T for k in range(3)]        # conv2 taps, each (H, H)
    WbT = wb[:, :, 0].T                          # bypass 1x1, (C, H)
    zc = jnp.zeros((C, H), jnp.float32)

    # W1ext: (6C, 5H).  Column group g (g=0..3) = act position 2m+g-1, using
    # tap k = r - g of window block r (x[2m+r-2]).  Column group 4 = bypass:
    # x[2m], x[2m+1] (blocks 2,3) through 0.5*Wb (AvgPool folded in).
    rows = []
    for r in range(6):
        blocks = [T[r - g] if 0 <= r - g <= 2 else zc for g in range(4)]
        blocks.append(0.5 * WbT if r in (2, 3) else zc)
        rows.append(jnp.concatenate(blocks, axis=1))
    W1 = jnp.concatenate(rows, axis=0)           # (6C, 5H)

    # conv2 with AvgPool1d(2) folded: out[m] = 0.5*(y[2m] + y[2m+1]).
    W2 = jnp.concatenate([0.5 * V[0], 0.5 * (V[0] + V[1]),
                          0.5 * (V[1] + V[2]), 0.5 * V[2]], axis=0)   # (4H, H)

    b1_4 = jnp.tile(b1, 4)[None, :]              # (1, 4H) f32
    bo = (b2 + bb)[None, :]                      # (1, H)  f32
    return W1.astype(compute_dtype), W2.astype(compute_dtype), b1_4, bo


def _pick_tile(m, target=256):
    # Largest row tile <= target that divides M (multiple of 16 so the bf16
    # input blocks stay sublane-tile friendly); fall back to a single block.
    if m <= target:
        return m
    tm = target - target % 16
    while tm >= 16 and m % tm:
        tm -= 16
    return tm if tm >= 16 and m % tm == 0 else m


# ------------------------------- wrapper -------------------------------------
def resblockd0_forward(x_ncl, params, *, tile_rows=256,
                       compute_dtype=jnp.bfloat16):
    B, C, L = x_ncl.shape
    assert L % 2 == 0, "AvgPool1d(2) path implemented for even lengths"
    H = params['b1'].shape[0]
    Lh = L // 2
    M = B * Lh

    # TODO(synk): keep channel-last activations end-to-end to drop this transpose.
    x_nlc = jnp.transpose(x_ncl, (0, 2, 1))                    # (B, L, C)
    x_pad = jnp.pad(x_nlc, ((0, 0), (2, 2), (0, 0)))           # conv1 "same" pad
    # im2col-lite window: row m holds [x[2m-2] .. x[2m+3]]  (6*C lanes).
    xwin = jnp.concatenate([x_pad[:, k:k + L:2, :] for k in range(6)],
                           axis=-1).reshape(M, 6 * C).astype(compute_dtype)
    rowpos = (jnp.arange(M, dtype=jnp.int32) % Lh)[:, None]    # (M, 1)

    W1, W2, b1_4, bo = _pack_weights(params, compute_dtype)

    TM = _pick_tile(M, tile_rows)
    kern = partial(resblockd0_kernel, half_len=Lh, hidden=H)
    out = pl.pallas_call(
        kern,
        out_shape=jax.ShapeDtypeStruct((M, H), jnp.float32),
        grid=(M // TM,),
        in_specs=[
            pl.BlockSpec((TM, 6 * C), lambda i: (i, 0)),
            pl.BlockSpec((TM, 1), lambda i: (i, 0)),
            # Weights/biases: constant block index -> resident across grid steps.
            pl.BlockSpec((6 * C, 5 * H), lambda i: (0, 0)),
            pl.BlockSpec((4 * H, H), lambda i: (0, 0)),
            pl.BlockSpec((1, 4 * H), lambda i: (0, 0)),
            pl.BlockSpec((1, H), lambda i: (0, 0)),
        ],
        out_specs=pl.BlockSpec((TM, H), lambda i: (i, 0)),
        compiler_params=pltpu.CompilerParams(
            dimension_semantics=("parallel",),
            vmem_limit_bytes=32 * 1024 * 1024),
    )(xwin, rowpos, W1, W2, b1_4, bo)

    # TODO(synk): emit channel-last output and drop this transpose in a fused pipeline.
    return jnp.transpose(out.reshape(B, Lh, H), (0, 2, 1))     # (B, H, L//2)


# -------------------------- parameter construction ---------------------------
def xavier_uniform(key, shape, gain):
    # shape = (out, in, k); PyTorch fan_in = in*k, fan_out = out*k
    fan_in = shape[1] * shape[2]
    fan_out = shape[0] * shape[2]
    bound = gain * math.sqrt(6.0 / (fan_in + fan_out))
    return jax.random.uniform(key, shape, jnp.float32, -bound, bound)


def conv_bias(key, w_shape):
    fan_in = w_shape[1] * w_shape[2]
    bound = 1.0 / math.sqrt(fan_in)
    return jax.random.uniform(key, (w_shape[0],), jnp.float32, -bound, bound)


def spectral_norm(w, key):
    # One power iteration with a deterministic random u (mirrors the standard
    # SNGAN SpectralNorm module's first forward pass), folded into the weights
    # on the host before the kernel runs.
    out = w.shape[0]
    w_mat = w.reshape(out, -1)
    u = jax.random.normal(key, (out,), jnp.float32)
    u = u / (jnp.linalg.norm(u) + 1e-12)
    v = w_mat.T @ u
    v = v / (jnp.linalg.norm(v) + 1e-12)
    u = w_mat @ v
    u = u / (jnp.linalg.norm(u) + 1e-12)
    sigma = jnp.dot(u, w_mat @ v)
    return w / sigma


# ------------------------------ pure-JAX reference ---------------------------
def reference_forward(x, params):
    def conv1d(x, w, b, pad):
        y = jax.lax.conv_general_dilated(
            x, w, window_strides=(1,), padding=[(pad, pad)],
            dimension_numbers=('NCH', 'OIH', 'NCH'))
        return y + b[None, :, None]

    def avgpool2(x):
        B, C, L = x.shape
        return x.reshape(B, C, L // 2, 2).mean(-1)

    h = conv1d(x, params['w1'], params['b1'], 1)
    h = jnp.where(h > 0, h, 0.1 * h)
    h = conv1d(h, params['w2'], params['b2'], 1)
    main = avgpool2(h)
    byp = conv1d(avgpool2(x), params['wb'], params['bb'], 0)
    return main + byp


# ----------------------------------- main -------------------------------------
if __name__ == "__main__":
    B, n_chars, hidden, L = 2, 4, 32, 16

    key = jax.random.PRNGKey(0)
    keys = jax.random.split(key, 8)

    w1 = xavier_uniform(keys[0], (hidden, n_chars, 3), 1.0)
    w2 = xavier_uniform(keys[1], (hidden, hidden, 3), 1.0)
    wb = xavier_uniform(keys[2], (hidden, n_chars, 1), math.sqrt(2.0))
    b1 = conv_bias(keys[3], (hidden, n_chars, 3))
    b2 = conv_bias(keys[4], (hidden, hidden, 3))
    bb = conv_bias(keys[5], (hidden, n_chars, 1))

    params = {
        'w1': spectral_norm(w1, jax.random.fold_in(keys[6], 1)),
        'w2': spectral_norm(w2, jax.random.fold_in(keys[6], 2)),
        'wb': spectral_norm(wb, jax.random.fold_in(keys[6], 3)),
        'b1': b1, 'b2': b2, 'bb': bb,
    }

    x = jax.random.normal(keys[7], (B, n_chars, L), jnp.float32)  # NCL like PyTorch

    out = resblockd0_forward(x, params)
    out = jax.block_until_ready(out)

    ref = reference_forward(x, params)
    assert out.shape == (B, hidden, L // 2)
    # bf16 matmul operands (f32 accumulation) -> tolerance loosened accordingly.
    max_err = float(jnp.max(jnp.abs(out - ref)))
    assert jnp.allclose(out, ref, atol=5e-2, rtol=5e-2), max_err

    print("KERNEL_OK")
</pallas_src>

<mosaic_0001>
module attributes {stable_mosaic.version = 11 : i64} {
  func.func @resblockd0_kernel(%arg0: i32, %arg1: memref<16x24xbf16, #tpu.memory_space<vmem>>, %arg2: memref<16x1xi32, #tpu.memory_space<vmem>>, %arg3: memref<24x160xbf16, #tpu.memory_space<vmem>>, %arg4: memref<128x32xbf16, #tpu.memory_space<vmem>>, %arg5: memref<1x128xf32, #tpu.memory_space<vmem>>, %arg6: memref<1x32xf32, #tpu.memory_space<vmem>>, %arg7: memref<16x32xf32, #tpu.memory_space<vmem>>) attributes {dimension_semantics = [#tpu.dimension_semantics<parallel>], iteration_bounds = array<i64: 1>, scalar_prefetch = 0 : i64, scratch_operands = 0 : i64, tpu.core_type = #tpu.core_type<tc>, window_params = [{transform_indices = @transform_0, window_bounds = array<i64: 16, 24>}, {transform_indices = @transform_1, window_bounds = array<i64: 16, 1>}, {pipeline_mode = #tpu.pipeline_mode<synchronous>, transform_indices = @transform_2, window_bounds = array<i64: 24, 160>}, {pipeline_mode = #tpu.pipeline_mode<synchronous>, transform_indices = @transform_3, window_bounds = array<i64: 128, 32>}, {pipeline_mode = #tpu.pipeline_mode<synchronous>, transform_indices = @transform_4, window_bounds = array<i64: 1, 128>}, {pipeline_mode = #tpu.pipeline_mode<synchronous>, transform_indices = @transform_5, window_bounds = array<i64: 1, 32>}, {transform_indices = @transform_6, window_bounds = array<i64: 16, 32>}]} {
    %c0 = arith.constant 0 : index
    %c0_0 = arith.constant 0 : index
    %0 = vector.load %arg1[%c0, %c0_0] : memref<16x24xbf16, #tpu.memory_space<vmem>>, vector<16x24xbf16>
    %c0_1 = arith.constant 0 : index
    %c0_2 = arith.constant 0 : index
    %1 = vector.load %arg3[%c0_1, %c0_2] : memref<24x160xbf16, #tpu.memory_space<vmem>>, vector<24x160xbf16>
    %cst = arith.constant dense<0.000000e+00> : vector<16x160xf32>
    %2 = tpu.matmul %0, %1, %cst {dimension_numbers = #tpu.dot_dimension_numbers<[1], [0], [0], [1], [0, 0, 1, 1], [], []>} : vector<16x24xbf16>, vector<24x160xbf16>, vector<16x160xf32> -> vector<16x160xf32>
    %3 = vector.extract_strided_slice %2 {offsets = [0, 0], sizes = [16, 128], strides = [1, 1]} : vector<16x160xf32> to vector<16x128xf32>
    %c0_3 = arith.constant 0 : index
    %c0_4 = arith.constant 0 : index
    %4 = vector.load %arg5[%c0_3, %c0_4] : memref<1x128xf32, #tpu.memory_space<vmem>>, vector<1x128xf32>
    %5 = vector.broadcast %4 : vector<1x128xf32> to vector<16x128xf32>
    %6 = arith.addf %3, %5 : vector<16x128xf32>
    %7 = vector.extract_strided_slice %2 {offsets = [0, 128], sizes = [16, 32], strides = [1, 1]} : vector<16x160xf32> to vector<16x32xf32>
    %c0_5 = arith.constant 0 : index
    %c0_6 = arith.constant 0 : index
    %8 = vector.load %arg2[%c0_5, %c0_6] : memref<16x1xi32, #tpu.memory_space<vmem>>, vector<16x1xi32>
    %9 = tpu.iota {dimensions = array<i32: 1>} : vector<1x128xi32>
    %c0_i32 = arith.constant 0 : i32
    %10 = vector.broadcast %c0_i32 : i32 to vector<16x1xi32>
    %11 = arith.cmpi eq, %8, %10 : vector<16x1xi32>
    %c32_i32 = arith.constant 32 : i32
    %12 = vector.broadcast %c32_i32 : i32 to vector<1x128xi32>
    %13 = arith.cmpi slt, %9, %12 : vector<1x128xi32>
    %14 = vector.broadcast %11 : vector<16x1xi1> to vector<16x128xi1>
    %15 = vector.broadcast %13 : vector<1x128xi1> to vector<16x128xi1>
    %16 = arith.andi %14, %15 : vector<16x128xi1>
    %c7_i32 = arith.constant 7 : i32
    %17 = vector.broadcast %c7_i32 : i32 to vector<16x1xi32>
    %18 = arith.cmpi eq, %8, %17 : vector<16x1xi32>
    %c96_i32 = arith.constant 96 : i32
    %19 = vector.broadcast %c96_i32 : i32 to vector<1x128xi32>
    %20 = arith.cmpi sge, %9, %19 : vector<1x128xi32>
    %21 = vector.broadcast %18 : vector<16x1xi1> to vector<16x128xi1>
    %22 = vector.broadcast %20 : vector<1x128xi1> to vector<16x128xi1>
    %23 = arith.andi %21, %22 : vector<16x128xi1>
    %24 = arith.ori %16, %23 : vector<16x128xi1>
    %cst_7 = arith.constant 0.000000e+00 : f32
    %25 = vector.broadcast %cst_7 : f32 to vector<16x128xf32>
    %26 = arith.select %24, %25, %6 : vector<16x128xi1>, vector<16x128xf32>
    %cst_8 = arith.constant 1.000000e-01 : f32
    %27 = vector.broadcast %cst_8 : f32 to vector<16x128xf32>
    %28 = arith.mulf %27, %26 : vector<16x128xf32>
    %29 = arith.maximumf %26, %28 : vector<16x128xf32>
    %30 = arith.truncf %29 : vector<16x128xf32> to vector<16x128xbf16>
    %c0_9 = arith.constant 0 : index
    %c0_10 = arith.constant 0 : index
    %31 = vector.load %arg4[%c0_9, %c0_10] : memref<128x32xbf16, #tpu.memory_space<vmem>>, vector<128x32xbf16>
    %cst_11 = arith.constant dense<0.000000e+00> : vector<16x32xf32>
    %32 = tpu.matmul %30, %31, %cst_11 {dimension_numbers = #tpu.dot_dimension_numbers<[1], [0], [0], [1], [0, 0, 1, 1], [], []>} : vector<16x128xbf16>, vector<128x32xbf16>, vector<16x32xf32> -> vector<16x32xf32>
    %33 = arith.addf %32, %7 : vector<16x32xf32>
    %c0_12 = arith.constant 0 : index
    %c0_13 = arith.constant 0 : index
    %34 = vector.load %arg6[%c0_12, %c0_13] : memref<1x32xf32, #tpu.memory_space<vmem>>, vector<1x32xf32>
    %35 = vector.broadcast %34 : vector<1x32xf32> to vector<16x32xf32>
    %36 = arith.addf %33, %35 : vector<16x32xf32>
    %c0_14 = arith.constant 0 : index
    %c0_15 = arith.constant 0 : index
    %37 = vector.load %arg7[%c0_14, %c0_15] : memref<16x32xf32, #tpu.memory_space<vmem>>, vector<16x32xf32>
    tpu.vector_store %arg7[%c0_14, %c0_15], %36 {strides = array<i32>} : memref<16x32xf32, #tpu.memory_space<vmem>>, vector<16x32xf32>,
    return
  }
  func.func @transform_0(%arg0: i32) -> (i32, i32) {
    %c0_i32 = arith.constant 0 : i32
    %c0_i32_0 = arith.constant 0 : i32
    return %arg0, %c0_i32 : i32, i32
  }
  func.func @transform_1(%arg0: i32) -> (i32, i32) {
    %c0_i32 = arith.constant 0 : i32
    %c0_i32_0 = arith.constant 0 : i32
    return %arg0, %c0_i32 : i32, i32
  }
  func.func @transform_2(%arg0: i32) -> (i32, i32) {
    %c0_i32 = arith.constant 0 : i32
    %c0_i32_0 = arith.constant 0 : i32
    %c0_i32_1 = arith.constant 0 : i32
    return %c0_i32, %c0_i32_0 : i32, i32
  }
  func.func @transform_3(%arg0: i32) -> (i32, i32) {
    %c0_i32 = arith.constant 0 : i32
    %c0_i32_0 = arith.constant 0 : i32
    %c0_i32_1 = arith.constant 0 : i32
    return %c0_i32, %c0_i32_0 : i32, i32
  }
  func.func @transform_4(%arg0: i32) -> (i32, i32) {
    %c0_i32 = arith.constant 0 : i32
    %c0_i32_0 = arith.constant 0 : i32
    %c0_i32_1 = arith.constant 0 : i32
    return %c0_i32, %c0_i32_0 : i32, i32
  }
  func.func @transform_5(%arg0: i32) -> (i32, i32) {
    %c0_i32 = arith.constant 0 : i32
    %c0_i32_0 = arith.constant 0 : i32
    %c0_i32_1 = arith.constant 0 : i32
    return %c0_i32, %c0_i32_0 : i32, i32
  }
  func.func @transform_6(%arg0: i32) -> (i32, i32) {
    %c0_i32 = arith.constant 0 : i32
    %c0_i32_0 = arith.constant 0 : i32
    return %arg0, %c0_i32 : i32, i32
  }
}

</mosaic_0001>

<bundles_post_ra>
// kernel: tpu_custom_call.1
= control target key start
LH: loop header
LB: loop body
LE: loop exit
PB: predicated region body
PF: predicated region fallthrough
CT: control target
= control target key end

     0   :  { %vm54_vm0 = vcmask 1043456   ;;  %v385_v3 = vmov 0   ;;  %v386_v8 = vmov 0.0   ;;  %vm50_vm5 = vcmask 195584   ;;  %s488_s0 = inlined_call_operand.vmem [shape: bf16[16,24], index: 0, kind: input, shape index: {}]   ;;  %s489_s1 = inlined_call_operand.vmem [shape: s32[16,1], index: 1, kind: input, shape index: {}]   ;;  %s490_s2 = inlined_call_operand.vmem [shape: bf16[24,160], index: 2, kind: input, shape index: {}]   ;;  %s491_s3 = inlined_call_operand.vmem [shape: bf16[128,32], index: 3, kind: input, shape index: {}]   ;;  %s492_s4 = inlined_call_operand.vmem [shape: f32[1,128], index: 4, kind: input, shape index: {}]   ;;  %s493_s5 = inlined_call_operand.vmem [shape: f32[1,32], index: 5, kind: input, shape index: {}]   ;;  %s494_s6 = inlined_call_operand.hbm [shape: f32[16,32], index: 6, kind: output, shape index: {}]  }
   0x1   :  { %v347_v0 = vld [vmem:[%s490_s2 + $0x4] ss:$8 sps:$4 sm:$0xff]   ;;  %v349_v1 = vld [vmem:[%s490_s2] ss:$8 sps:$4 sm:$0xff]   ;;  %v29_v2 = vld [vmem:[%s490_s2 + $0x10] sm:$0xff]  ;;  %93 = vmatprep.mubr.bf16.mxu0 %v385_v3  ;;  %346 = vset.pattern.permute.xlu1 %v385_v3 }
   0x2   :  { %61 = vmatprep.subr.bf16.mxu0 %v347_v0  ;;  %v297_v4 = vcombine.high %v29_v2, %v29_v2  ;;  %v296_v5 = vcombine.low %v29_v2, %v29_v2  ;;  %345 = vset.pattern.permute.xlu0 %v385_v3  ;;  %v113_v6 = vld [vmem:[%s489_s1] sm:$0xff]  ;;  %v114_v7 = vld [vmem:[%s489_s1 + $0x8] sm:$0xff]  ;;  %v355_v17 = vld [vmem:[%s491_s3 + $0x10] sm:$0xff]  }
   0x3   :  { %62 = vmatpush1.bf16.msra.mxu0 %v349_v1  ;;  %vm134_vm1 = vcmp.eq.s32.totalorder %v113_v6, 7  ;;  %vm117_vm2 = vcmp.eq.s32.totalorder %v113_v6, 0  ;;  %319 = vmatprep.subr.bf16.mxu1 %v386_v8  ;;  %v353_v9 = vld [vmem:[%s491_s3] sm:$0xff]   ;;  %vm135_vm3 = vcmp.eq.s32.totalorder %v114_v7, 7  ;;  %vm118_vm4 = vcmp.eq.s32.totalorder %v114_v7, 0  ;;  %v354_v16 = vld [vmem:[%s491_s3 + $0x8] sm:$0xff]  }
   0x4   :  { %298 = vmatprep.subr.msk.bf16.mxu0 %vm54_vm0, %v297_v4  ;;  %v56_v10 = vsel %vm54_vm0, %v296_v5, 0  ;;  %v352_v11 = vld [vmem:[%s488_s0] sm:$0xff]   ;;  %v137_v12 = vsel %vm134_vm1, 1, %v385_v3  ;;  %v120_v13 = vsel %vm117_vm2, 1, %v385_v3  ;;  %v138_v14 = vsel %vm135_vm3, 1, %v385_v3  ;;  %320 = vmatpush3.bf16.msra.mxu1 %v353_v9 }
   0x5   :  { %140 = vperm.xlu1 %346, %v137_v12   ;;  %123 = vperm.xlu0 %345, %v120_v13   ;;  %v121_v15 = vsel %vm118_vm4, 1, %v385_v3 }
   0x6   :  { %321 = vmatprep.subr.bf16.mxu1 %v386_v8 }
   0x7   :  { %64 = vmatpush1.bf16.msra.mxu0 %v56_v10 }
   0x8   :  { %322 = vmatpush3.bf16.msra.mxu1 %v354_v16 }
   0x9   :  { %143 = vperm.xlu1 %346, %v138_v14   ;;  %126 = vperm.xlu0 %345, %v121_v15  }
   0xa   :  { %299 = vmatmul.mubr.msk.bf16.vlgmr.msra.gmra.mrb[0].mxu0 %vm50_vm5, %v352_v11  ;;  %323 = vmatprep.subr.bf16.mxu1 %v386_v8 }
   0xb   :  { %11 = vsyncpa [#allocation3], 0  ;;  %v356_v18 = vld [vmem:[%s491_s3 + $0x18] sm:$0xff]   ;;  %v357_v19 = vld [vmem:[%s491_s3 + $0x20] sm:$0xff]   ;;  %vm387_vm6 = vmmov 0   ;;  %v115_v23 = vlaneseq  ;;  %s388_s24 = smov [#allocation2]  }
   0xc   :  { %324 = vmatpush3.bf16.msra.mxu1 %v355_v17  ;;  %v358_v20 = vld [vmem:[%s491_s3 + $0x28] sm:$0xff]   ;;  %v359_v21 = vld [vmem:[%s491_s3 + $0x30] sm:$0xff]   ;;  %v360_v22 = vld [vmem:[%s491_s3 + $0x38] sm:$0xff]   ;;  %335 = vmatprep.mubr.msk.bf16.mxu1 %vm387_vm6, %v386_v8  ;;  %s282_s25 = sshll.u32 %s388_s24, 4  ;;  %vm274_vm3 = vcmask 261120   ;;  %s283_s25 = int_to_ptr.vmem [resolvable:$true] %s282_s25 }
   0xd   :  { %325 = vmatprep.subr.bf16.mxu1 %v386_v8  ;;  %v116_v26 = vand.u32 127, %v115_v23  ;;  %v300_v29 = vld [vmem:[%s492_s4] ss:$0 sm:$0xff]  ;;  %s361_s26 = scalar_lea.vmem %s283_s25, 256  ;;  %p366_p1 = scmp.lt.s32.totalorder %s283_s25, %s283_s25 }
   0xe   :  { %v309_v44 = vld [vmem:[%s493_s5] ss:$0 sm:$0xff]  ;;  %p362_p0 = scmp.ne.s32.totalorder %s283_s25, %s361_s26  ;;  %p367_p2 = scmp.lt.s32.totalorder %s361_s26, %s361_s26 }
   0xf   :  { %vm136_vm7 = vcmp.ge.s32.totalorder %v116_v26, 96  ;;  %vm119_vm9 = vcmp.lt.s32.totalorder %v116_v26, 32 }
  0x10   :  { %326 = vmatpush3.bf16.msra.mxu1 %v356_v18  ;;  %p368_p3 = por %p367_p2, %p366_p1 }
  0x11   :  { %327 = vmatprep.subr.bf16.mxu1 %v386_v8 }
  0x12   :  { %p369_p4 = pnand %p368_p3, %p362_p0 }
  0x14   :  { %328 = vmatpush3.bf16.msra.mxu1 %v357_v19 }
  0x15   :  { %329 = vmatprep.subr.bf16.mxu1 %v386_v8 }
  0x18   :  { %330 = vmatpush3.bf16.msra.mxu1 %v358_v20 }
  0x19   :  { %331 = vmatprep.subr.bf16.mxu1 %v386_v8 }
  0x1c   :  { %332 = vmatpush3.bf16.msra.mxu1 %v359_v21 }
  0x1d   :  { %333 = vmatprep.subr.bf16.mxu1 %v386_v8 }
  0x20   :  { %334 = vmatpush3.bf16.msra.mxu1 %v360_v22 }
  0x84   :  { %v141_v24 = vpop.permute.xlu1 %140  ;;  %v124_v25 = vpop.permute.xlu0 %123 }
  0x85   :  { %vm145_vm8 = vcmp.eq.s32.totalorder %v141_v24, 1  ;;  %vm128_vm10 = vcmp.eq.s32.totalorder %v124_v25, 1 }
  0x86   :  { %vm149_vm12 = vmand %vm145_vm8, %vm136_vm7 }
  0x87   :  { %vm132_vm14 = vmand %vm128_vm10, %vm119_vm9 }
  0x88   :  { %v144_v27 = vpop.permute.xlu1 %143  ;;  %v127_v28 = vpop.permute.xlu0 %126  ;;  %vm151_vm1 = vmor %vm132_vm14, %vm149_vm12 }
  0x89   :  { %vm146_vm11 = vcmp.eq.s32.totalorder %v144_v27, 1  ;;  %vm129_vm13 = vcmp.eq.s32.totalorder %v127_v28, 1 }
  0x8a   :  { %vm150_vm15 = vmand %vm146_vm11, %vm136_vm7 }
  0x8b   :  { %vm133_vm0 = vmand %vm129_vm13, %vm119_vm9 }
  0x8c   :  { %vm152_vm2 = vmor %vm133_vm0, %vm150_vm15 }
  0xdd   :  { %v95_v30 = vpop.f32.mrb[0].mxu0 }
  0xde   :  { %v111_v31 = vadd.f32 %v300_v29, %v95_v30  ;;  %v97_v32 = vpop.f32.mrb[1].mxu0 }
  0xdf   :  { %v99_v33 = vpop.f32.mrb[2].mxu0 }
  0xe0   :  { %v153_v34 = vsel %vm151_vm1, 0.0, %v111_v31  ;;  %v112_v35 = vadd.f32 %v300_v29, %v99_v33  ;;  %v101_v36 = vpop.f32.mrb[3].mxu0 }
  0xe1   :  { %v155_v37 = vmul.f32 0.1, %v153_v34 }
  0xe2   :  { %v154_v38 = vsel %vm152_vm2, 0.0, %v112_v35 }
  0xe3   :  { %v156_v39 = vmul.f32 0.1, %v154_v38  ;;  %v157_v40 = vmax.f32 %v153_v34, %v155_v37 }
  0xe5   :  { %v158_v41 = vmax.f32 %v154_v38, %v156_v39 }
  0xe7   :  { %v159_v42 = vpack.c.bf16 %v158_v41, %v157_v40 }
  0xe9   :  { %336 = vmatmul.mubr.bf16.vlgmr.msra.gmra.mrb[0].mxu1 %v159_v42 }
 0x1bc   :  { %v258_v43 = vpop.f32.mrb[0].mxu1 }
 0x1bd   :  { %v259_v45 = vadd.f32 %v258_v43, %v97_v32  ;;  %v337_v46 = vpop.f32.mrb[1].mxu1 }
 0x1be   :  { %v261_v47 = vpop.f32.mrb[2].mxu1 }
 0x1bf   :  { %v272_v48 = vadd.f32 %v309_v44, %v259_v45  ;;  %v262_v49 = vadd.f32 %v261_v47, %v101_v36  ;;  %v338_v50 = vpop.f32.mrb[3].mxu1 }
 0x1c1   :  { %275 = vst.msk [vmem:[#allocation2] sm:$0xff] %vm274_vm3, %v272_v48  ;;  %v273_v51 = vadd.f32 %v309_v44, %v262_v49 }
 0x1c3   :  { %276 = vst.msk [vmem:[#allocation2 + $0x8] sm:$0xff] %vm274_vm3, %v273_v51 }
 0x1c4   :  { %372 = shalt.err (!%p369_p4)
}
 0x1c5   :  { %s373_s28 = scalar_lea.hbm %s494_s6, 256 }
 0x1c6   :  { %p374_p5 = scmp.ne.s32.totalorder %s494_s6, %s373_s28  ;;  %p377_p6 = scmp.lt.u32.totalorder %s373_s28, %s494_s6 }
 0x1c8   :  { %p379_p7 = pnand %p377_p6, %p374_p5 }
 0x1ca   :  { %382 = shalt.err (!%p379_p7)
}
 0x1cb   :  { %s389_s8 = smov 128   ;;  %s390_s9 = smov 8  }
 0x1cc   :  { %288 = dma.vmem_to_hbm [thread:$0]  %s283_s25, 256, %s494_s6, [#allocation3], %s389_s8, %s389_s8, %s390_s9  }
 0x1cd   :  { %383 = dma.done.wait [#allocation3], 256  }
 0x1ce   :  { %384 = vsyncadd [#allocation3], 4294967040 }
 0x1cf   :  { %292 = vsyncpa [#allocation3], 1 }

</bundles_post_ra>
